<compile_context>
chip_gen: v7x
topology: tpu7x:2x2x1
jax: 0.10.0
libtpu: 0.0.40
codegen_flags: <defaults>
</compile_context>

<pallas_src>
import math
import numpy as np
import jax
import jax.numpy as jnp
from jax.experimental import pallas as pl
from jax.experimental.pallas import tpu as pltpu


# ----------------------------------------------------------------------------
# Noise schedule (numpy replica of make_beta_schedule / set_new_noise_schedule)
# ----------------------------------------------------------------------------
def _linear_beta_schedule(n_timestep, linear_start=1e-4, linear_end=2e-2):
    return np.linspace(linear_start, linear_end, n_timestep, dtype=np.float64)


def _torch_bicubic_matrix(in_size, out_size):
    """(out,in) matrix replicating torch.nn.functional.interpolate bicubic,
    align_corners=False, antialias=False (cubic convolution, A=-0.75)."""
    A = -0.75

    def cubic1(x):
        return ((A + 2.0) * x - (A + 3.0)) * x * x + 1.0

    def cubic2(x):
        return ((A * x - 5.0 * A) * x + 8.0 * A) * x - 4.0 * A

    W = np.zeros((out_size, in_size), dtype=np.float64)
    scale = in_size / out_size
    for i in range(out_size):
        src = (i + 0.5) * scale - 0.5
        f = int(math.floor(src))
        t = src - f
        coeffs = (cubic2(t + 1.0), cubic1(t), cubic1(1.0 - t), cubic2(2.0 - t))
        for k in range(4):
            idx = min(max(f - 1 + k, 0), in_size - 1)
            W[i, idx] += coeffs[k]
    return W


# ----------------------------------------------------------------------------
# Pallas kernel + wrapper
# ----------------------------------------------------------------------------
def gaussian_diffusion_forward(hr, sr, lr, noise, cont_sqrt,
                               sqrt_recip_tm1, sqrt_recipm1_tm1,
                               w_sr, w_x, bias, t_w, dmat_h, dmat_w):
    B, C, H, W = hr.shape
    _, _, Hl, Wl = lr.shape
    assert H % 8 == 0, "H must be a multiple of 8 for tile-aligned channel slices"

    # Per-batch slabs: (B, C*H, W).  Block = (1, C*H, W) -> the last two block
    # dims equal the full array dims, so no (8,128) padding is required and
    # BlockSpec double-buffering pipelines HBM<->VMEM across batch steps.
    # TODO(synk): transfer HR/SR/noise as bf16 (upcast in-kernel) once loss
    # tolerance allows — halves DMA bytes on HBM-bound v5e/v6e.
    hr3 = hr.reshape(B, C * H, W).astype(jnp.float32)
    sr3 = sr.reshape(B, C * H, W).astype(jnp.float32)
    noise3 = noise.reshape(B, C * H, W).astype(jnp.float32)
    lr3 = lr.reshape(B, C * Hl, Wl).astype(jnp.float32)

    cont_sqrt = cont_sqrt.astype(jnp.float32)
    w_sr = w_sr.astype(jnp.float32)
    w_x = w_x.astype(jnp.float32)
    bias = bias.astype(jnp.float32)
    t_w = t_w.astype(jnp.float32)

    # Fold the (1 + c*t_w[o]) noise-level modulation and bias into per-(b,o)
    # effective scalar weights — computed once here, read from SMEM in-kernel.
    mod = 1.0 + cont_sqrt[:, None] * t_w[None, :]                 # (B, C)
    wsr_eff = mod[:, :, None] * w_sr[None, :, :]                  # (B, C, C)
    wx_eff = mod[:, :, None] * w_x[None, :, :]                    # (B, C, C)
    b_eff = mod * bias[None, :]                                   # (B, C)
    per_o = jnp.concatenate([wsr_eff, wx_eff, b_eff[:, :, None]], axis=2)  # (B,C,2C+1)

    coef = jnp.concatenate([
        jnp.stack([
            cont_sqrt,                                            # c_b
            jnp.sqrt(1.0 - cont_sqrt ** 2),                       # sqrt(1-c_b^2)
            jnp.full((B,), sqrt_recip_tm1, jnp.float32),          # sqrt_recip_alphas_cumprod[t-1]
            jnp.full((B,), sqrt_recipm1_tm1, jnp.float32),        # sqrt_recipm1_alphas_cumprod[t-1]
        ], axis=1),
        per_o.reshape(B, C * (2 * C + 1)),
    ], axis=1).astype(jnp.float32)                                # (B, 4 + C*(2C+1)) -> SMEM

    # Batched separable bicubic operators: block-diagonal I_C⊗Dh and Dw^T.
    bdh = jnp.asarray(np.kron(np.eye(C), np.asarray(dmat_h, np.float64)),
                      jnp.float32)                                # (C*Hl, C*H)
    dwt = dmat_w.astype(jnp.float32).T                            # (W, Wl)

    stride = 2 * C + 1
    alpha = 0.6

    def kernel(coef_ref,                                          # SMEM scalar table
               hr_ref, sr_ref, noise_ref, lr_ref, bdh_ref, dwt_ref,
               loss_ref, eps_scr):
        b = pl.program_id(0)

        hr_s = hr_ref[0]                                          # (C*H, W)
        sr_s = sr_ref[0]
        nz_s = noise_ref[0]
        lr_s = lr_ref[0]                                          # (C*Hl, Wl)

        c_sqrt = coef_ref[b, 0]
        s1mc2 = coef_ref[b, 1]
        rcp = coef_ref[b, 2]
        rcpm1 = coef_ref[b, 3]

        # q_sample on the full per-batch slab (single VPU pass over C*H rows).
        xn = c_sqrt * hr_s + s1mc2 * nz_s

        # Synthetic denoise_fn: 1x1 conv over concat([SR, x_noisy]) channels with
        # pre-folded modulation/bias -> 2C scalar-broadcast FMAs per output ch.
        # TODO(synk): real denoise_fn is an externally-injected UNet.
        for o in range(C):
            base = 4 + o * stride
            acc = (coef_ref[b, base] * sr_s[0:H, :]
                   + coef_ref[b, base + C] * xn[0:H, :]
                   + coef_ref[b, base + 2 * C])
            for i in range(1, C):
                acc = (acc
                       + coef_ref[b, base + i] * sr_s[i * H:(i + 1) * H, :]
                       + coef_ref[b, base + C + i] * xn[i * H:(i + 1) * H, :])
            eps_scr[o * H:(o + 1) * H, :] = acc
        eps = eps_scr[...]                                        # (C*H, W)

        # L1Loss(reduction='sum'): reconstruction term over the whole slab.
        rec = jnp.sum(jnp.sum(jnp.abs(nz_s - eps), axis=1, keepdims=True),
                      axis=0, keepdims=True)                      # (1,1)

        # predict_start_from_noise(x_noisy, t-1, eps) on the full slab.
        x_rec = rcp * xn - rcpm1 * eps                            # (C*H, W)

        # Batched separable torch-bicubic downsample: two MXU dots per batch.
        t1 = jnp.dot(x_rec, dwt_ref[...],
                     preferred_element_type=jnp.float32)          # (C*H, Wl)
        ds = jnp.dot(bdh_ref[...], t1,
                     preferred_element_type=jnp.float32)          # (C*Hl, Wl)

        con = jnp.sum(jnp.sum(jnp.abs(lr_s - ds), axis=1, keepdims=True),
                      axis=0, keepdims=True)                      # (1,1)

        loss_ref[0] = alpha * rec + (1.0 - alpha) * con           # per-batch partial loss

    grid_spec = pltpu.PrefetchScalarGridSpec(
        num_scalar_prefetch=1,                                    # coef table -> SMEM
        grid=(B,),
        in_specs=[
            pl.BlockSpec((1, C * H, W), lambda b, coef: (b, 0, 0)),    # HR
            pl.BlockSpec((1, C * H, W), lambda b, coef: (b, 0, 0)),    # SR
            pl.BlockSpec((1, C * H, W), lambda b, coef: (b, 0, 0)),    # noise
            pl.BlockSpec((1, C * Hl, Wl), lambda b, coef: (b, 0, 0)),  # LR
            pl.BlockSpec((C * Hl, C * H), lambda b, coef: (0, 0)),     # I_C ⊗ Dh (resident)
            pl.BlockSpec((W, Wl), lambda b, coef: (0, 0)),             # Dw^T     (resident)
        ],
        out_specs=pl.BlockSpec((1, 1, 1), lambda b, coef: (b, 0, 0)),
        scratch_shapes=[pltpu.VMEM((C * H, W), jnp.float32)],          # eps slab
    )

    # Explicit VMEM budget: double-buffered per-batch slabs + eps scratch +
    # resident operators, with headroom.  Stays well under v7x's 64 MiB at
    # realistic SR3 sizes because tiles are per-batch, not whole-batch.
    act_bytes = C * H * W * 4
    lr_bytes = C * Hl * Wl * 4
    op_bytes = (C * Hl * C * H + W * Wl) * 4
    per_step = 2 * (3 * act_bytes + lr_bytes) + act_bytes + 2 * op_bytes
    vmem_limit = int(min(100 * 2 ** 20, max(2 * per_step + (2 << 20), 16 * 2 ** 20)))

    losses = pl.pallas_call(
        kernel,
        out_shape=jax.ShapeDtypeStruct((B, 1, 1), jnp.float32),
        grid_spec=grid_spec,
        compiler_params=pltpu.CompilerParams(
            dimension_semantics=("parallel",),                    # 2 TCs split batch on v7x
            vmem_limit_bytes=vmem_limit),
    )(coef, hr3, sr3, noise3, lr3, bdh, dwt)

    return jnp.sum(losses)                                        # 0.6*rec_tot + 0.4*con_tot


# ----------------------------------------------------------------------------
# Demo
# ----------------------------------------------------------------------------
if __name__ == "__main__":
    # NOTE: realistic SR3 widths (>=128) are lane-dense; the demo stays small.
    B, C, H, Wd = 2, 3, 16, 16
    up_scale = 4                       # x_in['scale'] = 4 -> bicubic scale_factor 0.25
    Hl, Wl = H // up_scale, Wd // up_scale
    n_timestep = 100

    key = jax.random.PRNGKey(0)
    k_hr, k_sr, k_lr, k_noise, k_u, kw1, kw2, kb, kt = jax.random.split(key, 9)
    hr = jax.random.normal(k_hr, (B, C, H, Wd), jnp.float32)       # x_in['HR']
    sr = jax.random.normal(k_sr, (B, C, H, Wd), jnp.float32)       # x_in['SR']
    lr = jax.random.normal(k_lr, (B, C, Hl, Wl), jnp.float32)      # x_in['LR']
    noise = jax.random.normal(k_noise, (B, C, H, Wd), jnp.float32)

    # set_new_noise_schedule('linear', 100, 1e-4, 2e-2)
    betas = _linear_beta_schedule(n_timestep)
    alphas = 1.0 - betas
    alphas_cumprod = np.cumprod(alphas)
    sqrt_alphas_cumprod_prev = np.sqrt(np.append(1.0, alphas_cumprod))
    sqrt_recip_alphas_cumprod = np.sqrt(1.0 / alphas_cumprod)
    sqrt_recipm1_alphas_cumprod = np.sqrt(1.0 / alphas_cumprod - 1.0)

    # TODO(synk): reference draws t ~ np.random.randint(1, T+1); fixed here for determinism.
    t = n_timestep // 2
    cont_sqrt = jax.random.uniform(
        k_u, (B,), jnp.float32,
        minval=float(sqrt_alphas_cumprod_prev[t - 1]),
        maxval=float(sqrt_alphas_cumprod_prev[t]))

    # TODO(synk): denoise_fn is an externally-injected UNet; replaced by a
    # deterministic synthetic 1x1-conv + noise-level modulation stand-in.
    w_sr = jax.random.normal(kw1, (C, C), jnp.float32) * 0.3
    w_x = jax.random.normal(kw2, (C, C), jnp.float32) * 0.3
    bias = jax.random.normal(kb, (C,), jnp.float32) * 0.1
    t_w = jax.random.normal(kt, (C,), jnp.float32) * 0.1

    # Separable torch-bicubic downsample operators (row / column factors).
    dmat_h = jnp.asarray(_torch_bicubic_matrix(H, Hl), jnp.float32)   # (Hl, H)
    dmat_w = jnp.asarray(_torch_bicubic_matrix(Wd, Wl), jnp.float32)  # (Wl, W)

    sqrt_recip_tm1 = float(sqrt_recip_alphas_cumprod[t - 1])
    sqrt_recipm1_tm1 = float(sqrt_recipm1_alphas_cumprod[t - 1])

    # TODO(synk): print_fig / PIL image saving (random.random()-gated file I/O) is skipped.
    loss = gaussian_diffusion_forward(
        hr, sr, lr, noise, cont_sqrt, sqrt_recip_tm1, sqrt_recipm1_tm1,
        w_sr, w_x, bias, t_w, dmat_h, dmat_w)
    jax.block_until_ready(loss)

    # Pure-JAX reference check of the fused kernel (loose f32/MXU tolerance).
    c = cont_sqrt.reshape(B, 1, 1, 1)
    x_noisy = c * hr + jnp.sqrt(1.0 - c ** 2) * noise
    eps = (jnp.einsum('oi,bihw->bohw', w_sr, sr)
           + jnp.einsum('oi,bihw->bohw', w_x, x_noisy)
           + bias.reshape(1, C, 1, 1))
    eps = eps * (1.0 + c * t_w.reshape(1, C, 1, 1))
    loss_rec = jnp.sum(jnp.abs(noise - eps))
    x_rec = sqrt_recip_tm1 * x_noisy - sqrt_recipm1_tm1 * eps
    ds = jnp.einsum('uh,bchw,vw->bcuv', dmat_h, x_rec, dmat_w)
    loss_con = jnp.sum(jnp.abs(lr - ds))
    ref = 0.6 * loss_rec + 0.4 * loss_con
    if not np.allclose(float(loss), float(ref), rtol=5e-3, atol=5e-2):
        raise AssertionError(f"mismatch: kernel={float(loss)} ref={float(ref)}")

    print("KERNEL_OK")
</pallas_src>

<mosaic_0001>
module attributes {stable_mosaic.version = 11 : i64} {
  func.func @kernel(%arg0: i32, %arg1: memref<2x25xf32, #tpu.memory_space<smem>>, %arg2: memref<1x48x16xf32, #tpu.memory_space<vmem>>, %arg3: memref<1x48x16xf32, #tpu.memory_space<vmem>>, %arg4: memref<1x48x16xf32, #tpu.memory_space<vmem>>, %arg5: memref<1x12x4xf32, #tpu.memory_space<vmem>>, %arg6: memref<12x48xf32, #tpu.memory_space<vmem>>, %arg7: memref<16x4xf32, #tpu.memory_space<vmem>>, %arg8: memref<1x1x1xf32, #tpu.memory_space<vmem>>, %arg9: memref<48x16xf32, #tpu.memory_space<vmem>>) attributes {dimension_semantics = [#tpu.dimension_semantics<parallel>], iteration_bounds = array<i64: 2>, scalar_prefetch = 1 : i64, scratch_operands = 1 : i64, tpu.core_type = #tpu.core_type<tc>, window_params = [{transform_indices = @transform_0, window_bounds = array<i64: 1, 48, 16>}, {transform_indices = @transform_1, window_bounds = array<i64: 1, 48, 16>}, {transform_indices = @transform_2, window_bounds = array<i64: 1, 48, 16>}, {transform_indices = @transform_3, window_bounds = array<i64: 1, 12, 4>}, {pipeline_mode = #tpu.pipeline_mode<synchronous>, transform_indices = @transform_4, window_bounds = array<i64: 12, 48>}, {pipeline_mode = #tpu.pipeline_mode<synchronous>, transform_indices = @transform_5, window_bounds = array<i64: 16, 4>}, {transform_indices = @transform_6, window_bounds = array<i64: 1, 1, 1>}]} {
    %c0 = arith.constant 0 : index
    %c0_0 = arith.constant 0 : index
    %c0_1 = arith.constant 0 : index
    %0 = vector.load %arg2[%c0, %c0_0, %c0_1] : memref<1x48x16xf32, #tpu.memory_space<vmem>>, vector<1x48x16xf32>
    %1 = vector.shape_cast %0 : vector<1x48x16xf32> to vector<48x16xf32>
    %c0_2 = arith.constant 0 : index
    %c0_3 = arith.constant 0 : index
    %c0_4 = arith.constant 0 : index
    %2 = vector.load %arg3[%c0_2, %c0_3, %c0_4] : memref<1x48x16xf32, #tpu.memory_space<vmem>>, vector<1x48x16xf32>
    %3 = vector.shape_cast %2 : vector<1x48x16xf32> to vector<48x16xf32>
    %c0_5 = arith.constant 0 : index
    %c0_6 = arith.constant 0 : index
    %c0_7 = arith.constant 0 : index
    %4 = vector.load %arg4[%c0_5, %c0_6, %c0_7] : memref<1x48x16xf32, #tpu.memory_space<vmem>>, vector<1x48x16xf32>
    %5 = vector.shape_cast %4 : vector<1x48x16xf32> to vector<48x16xf32>
    %c0_8 = arith.constant 0 : index
    %c0_9 = arith.constant 0 : index
    %c0_10 = arith.constant 0 : index
    %6 = vector.load %arg5[%c0_8, %c0_9, %c0_10] : memref<1x12x4xf32, #tpu.memory_space<vmem>>, vector<1x12x4xf32>
    %7 = vector.shape_cast %6 : vector<1x12x4xf32> to vector<12x4xf32>
    %8 = arith.index_cast %arg0 : i32 to index
    %c0_11 = arith.constant 0 : index
    %9 = memref.load %arg1[%8, %c0_11] : memref<2x25xf32, #tpu.memory_space<smem>>
    %10 = arith.index_cast %arg0 : i32 to index
    %c1 = arith.constant 1 : index
    %11 = memref.load %arg1[%10, %c1] : memref<2x25xf32, #tpu.memory_space<smem>>
    %12 = arith.index_cast %arg0 : i32 to index
    %c2 = arith.constant 2 : index
    %13 = memref.load %arg1[%12, %c2] : memref<2x25xf32, #tpu.memory_space<smem>>
    %14 = arith.index_cast %arg0 : i32 to index
    %c3 = arith.constant 3 : index
    %15 = memref.load %arg1[%14, %c3] : memref<2x25xf32, #tpu.memory_space<smem>>
    %16 = vector.broadcast %9 : f32 to vector<48x16xf32>
    %17 = arith.mulf %16, %1 : vector<48x16xf32>
    %18 = vector.broadcast %11 : f32 to vector<48x16xf32>
    %19 = arith.mulf %18, %5 : vector<48x16xf32>
    %20 = arith.addf %17, %19 : vector<48x16xf32>
    %21 = arith.index_cast %arg0 : i32 to index
    %c4 = arith.constant 4 : index
    %22 = memref.load %arg1[%21, %c4] : memref<2x25xf32, #tpu.memory_space<smem>>
    %23 = vector.extract_strided_slice %3 {offsets = [0, 0], sizes = [16, 16], strides = [1, 1]} : vector<48x16xf32> to vector<16x16xf32>
    %24 = vector.broadcast %22 : f32 to vector<16x16xf32>
    %25 = arith.mulf %24, %23 : vector<16x16xf32>
    %26 = arith.index_cast %arg0 : i32 to index
    %c7 = arith.constant 7 : index
    %27 = memref.load %arg1[%26, %c7] : memref<2x25xf32, #tpu.memory_space<smem>>
    %28 = vector.extract_strided_slice %20 {offsets = [0, 0], sizes = [16, 16], strides = [1, 1]} : vector<48x16xf32> to vector<16x16xf32>
    %29 = vector.broadcast %27 : f32 to vector<16x16xf32>
    %30 = arith.mulf %29, %28 : vector<16x16xf32>
    %31 = arith.addf %25, %30 : vector<16x16xf32>
    %32 = arith.index_cast %arg0 : i32 to index
    %c10 = arith.constant 10 : index
    %33 = memref.load %arg1[%32, %c10] : memref<2x25xf32, #tpu.memory_space<smem>>
    %34 = vector.broadcast %33 : f32 to vector<16x16xf32>
    %35 = arith.addf %31, %34 : vector<16x16xf32>
    %36 = arith.index_cast %arg0 : i32 to index
    %c5 = arith.constant 5 : index
    %37 = memref.load %arg1[%36, %c5] : memref<2x25xf32, #tpu.memory_space<smem>>
    %38 = vector.extract_strided_slice %3 {offsets = [16, 0], sizes = [16, 16], strides = [1, 1]} : vector<48x16xf32> to vector<16x16xf32>
    %39 = vector.broadcast %37 : f32 to vector<16x16xf32>
    %40 = arith.mulf %39, %38 : vector<16x16xf32>
    %41 = arith.addf %35, %40 : vector<16x16xf32>
    %42 = arith.index_cast %arg0 : i32 to index
    %c8 = arith.constant 8 : index
    %43 = memref.load %arg1[%42, %c8] : memref<2x25xf32, #tpu.memory_space<smem>>
    %44 = vector.extract_strided_slice %20 {offsets = [16, 0], sizes = [16, 16], strides = [1, 1]} : vector<48x16xf32> to vector<16x16xf32>
    %45 = vector.broadcast %43 : f32 to vector<16x16xf32>
    %46 = arith.mulf %45, %44 : vector<16x16xf32>
    %47 = arith.addf %41, %46 : vector<16x16xf32>
    %48 = arith.index_cast %arg0 : i32 to index
    %c6 = arith.constant 6 : index
    %49 = memref.load %arg1[%48, %c6] : memref<2x25xf32, #tpu.memory_space<smem>>
    %50 = vector.extract_strided_slice %3 {offsets = [32, 0], sizes = [16, 16], strides = [1, 1]} : vector<48x16xf32> to vector<16x16xf32>
    %51 = vector.broadcast %49 : f32 to vector<16x16xf32>
    %52 = arith.mulf %51, %50 : vector<16x16xf32>
    %53 = arith.addf %47, %52 : vector<16x16xf32>
    %54 = arith.index_cast %arg0 : i32 to index
    %c9 = arith.constant 9 : index
    %55 = memref.load %arg1[%54, %c9] : memref<2x25xf32, #tpu.memory_space<smem>>
    %56 = vector.extract_strided_slice %20 {offsets = [32, 0], sizes = [16, 16], strides = [1, 1]} : vector<48x16xf32> to vector<16x16xf32>
    %57 = vector.broadcast %55 : f32 to vector<16x16xf32>
    %58 = arith.mulf %57, %56 : vector<16x16xf32>
    %59 = arith.addf %53, %58 : vector<16x16xf32>
    %c0_12 = arith.constant 0 : index
    %c0_13 = arith.constant 0 : index
    %60 = vector.load %arg9[%c0_12, %c0_13] : memref<48x16xf32, #tpu.memory_space<vmem>>, vector<16x16xf32>
    tpu.vector_store %arg9[%c0_12, %c0_13], %59 {strides = array<i32>} : memref<48x16xf32, #tpu.memory_space<vmem>>, vector<16x16xf32>,
    %61 = arith.index_cast %arg0 : i32 to index
    %c11 = arith.constant 11 : index
    %62 = memref.load %arg1[%61, %c11] : memref<2x25xf32, #tpu.memory_space<smem>>
    %63 = vector.extract_strided_slice %3 {offsets = [0, 0], sizes = [16, 16], strides = [1, 1]} : vector<48x16xf32> to vector<16x16xf32>
    %64 = vector.broadcast %62 : f32 to vector<16x16xf32>
    %65 = arith.mulf %64, %63 : vector<16x16xf32>
    %66 = arith.index_cast %arg0 : i32 to index
    %c14 = arith.constant 14 : index
    %67 = memref.load %arg1[%66, %c14] : memref<2x25xf32, #tpu.memory_space<smem>>
    %68 = vector.extract_strided_slice %20 {offsets = [0, 0], sizes = [16, 16], strides = [1, 1]} : vector<48x16xf32> to vector<16x16xf32>
    %69 = vector.broadcast %67 : f32 to vector<16x16xf32>
    %70 = arith.mulf %69, %68 : vector<16x16xf32>
    %71 = arith.addf %65, %70 : vector<16x16xf32>
    %72 = arith.index_cast %arg0 : i32 to index
    %c17 = arith.constant 17 : index
    %73 = memref.load %arg1[%72, %c17] : memref<2x25xf32, #tpu.memory_space<smem>>
    %74 = vector.broadcast %73 : f32 to vector<16x16xf32>
    %75 = arith.addf %71, %74 : vector<16x16xf32>
    %76 = arith.index_cast %arg0 : i32 to index
    %c12 = arith.constant 12 : index
    %77 = memref.load %arg1[%76, %c12] : memref<2x25xf32, #tpu.memory_space<smem>>
    %78 = vector.extract_strided_slice %3 {offsets = [16, 0], sizes = [16, 16], strides = [1, 1]} : vector<48x16xf32> to vector<16x16xf32>
    %79 = vector.broadcast %77 : f32 to vector<16x16xf32>
    %80 = arith.mulf %79, %78 : vector<16x16xf32>
    %81 = arith.addf %75, %80 : vector<16x16xf32>
    %82 = arith.index_cast %arg0 : i32 to index
    %c15 = arith.constant 15 : index
    %83 = memref.load %arg1[%82, %c15] : memref<2x25xf32, #tpu.memory_space<smem>>
    %84 = vector.extract_strided_slice %20 {offsets = [16, 0], sizes = [16, 16], strides = [1, 1]} : vector<48x16xf32> to vector<16x16xf32>
    %85 = vector.broadcast %83 : f32 to vector<16x16xf32>
    %86 = arith.mulf %85, %84 : vector<16x16xf32>
    %87 = arith.addf %81, %86 : vector<16x16xf32>
    %88 = arith.index_cast %arg0 : i32 to index
    %c13 = arith.constant 13 : index
    %89 = memref.load %arg1[%88, %c13] : memref<2x25xf32, #tpu.memory_space<smem>>
    %90 = vector.extract_strided_slice %3 {offsets = [32, 0], sizes = [16, 16], strides = [1, 1]} : vector<48x16xf32> to vector<16x16xf32>
    %91 = vector.broadcast %89 : f32 to vector<16x16xf32>
    %92 = arith.mulf %91, %90 : vector<16x16xf32>
    %93 = arith.addf %87, %92 : vector<16x16xf32>
    %94 = arith.index_cast %arg0 : i32 to index
    %c16 = arith.constant 16 : index
    %95 = memref.load %arg1[%94, %c16] : memref<2x25xf32, #tpu.memory_space<smem>>
    %96 = vector.extract_strided_slice %20 {offsets = [32, 0], sizes = [16, 16], strides = [1, 1]} : vector<48x16xf32> to vector<16x16xf32>
    %97 = vector.broadcast %95 : f32 to vector<16x16xf32>
    %98 = arith.mulf %97, %96 : vector<16x16xf32>
    %99 = arith.addf %93, %98 : vector<16x16xf32>
    %c16_14 = arith.constant 16 : index
    %c0_15 = arith.constant 0 : index
    %100 = vector.load %arg9[%c16_14, %c0_15] : memref<48x16xf32, #tpu.memory_space<vmem>>, vector<16x16xf32>
    tpu.vector_store %arg9[%c16_14, %c0_15], %99 {strides = array<i32>} : memref<48x16xf32, #tpu.memory_space<vmem>>, vector<16x16xf32>,
    %101 = arith.index_cast %arg0 : i32 to index
    %c18 = arith.constant 18 : index
    %102 = memref.load %arg1[%101, %c18] : memref<2x25xf32, #tpu.memory_space<smem>>
    %103 = vector.extract_strided_slice %3 {offsets = [0, 0], sizes = [16, 16], strides = [1, 1]} : vector<48x16xf32> to vector<16x16xf32>
    %104 = vector.broadcast %102 : f32 to vector<16x16xf32>
    %105 = arith.mulf %104, %103 : vector<16x16xf32>
    %106 = arith.index_cast %arg0 : i32 to index
    %c21 = arith.constant 21 : index
    %107 = memref.load %arg1[%106, %c21] : memref<2x25xf32, #tpu.memory_space<smem>>
    %108 = vector.extract_strided_slice %20 {offsets = [0, 0], sizes = [16, 16], strides = [1, 1]} : vector<48x16xf32> to vector<16x16xf32>
    %109 = vector.broadcast %107 : f32 to vector<16x16xf32>
    %110 = arith.mulf %109, %108 : vector<16x16xf32>
    %111 = arith.addf %105, %110 : vector<16x16xf32>
    %112 = arith.index_cast %arg0 : i32 to index
    %c24 = arith.constant 24 : index
    %113 = memref.load %arg1[%112, %c24] : memref<2x25xf32, #tpu.memory_space<smem>>
    %114 = vector.broadcast %113 : f32 to vector<16x16xf32>
    %115 = arith.addf %111, %114 : vector<16x16xf32>
    %116 = arith.index_cast %arg0 : i32 to index
    %c19 = arith.constant 19 : index
    %117 = memref.load %arg1[%116, %c19] : memref<2x25xf32, #tpu.memory_space<smem>>
    %118 = vector.extract_strided_slice %3 {offsets = [16, 0], sizes = [16, 16], strides = [1, 1]} : vector<48x16xf32> to vector<16x16xf32>
    %119 = vector.broadcast %117 : f32 to vector<16x16xf32>
    %120 = arith.mulf %119, %118 : vector<16x16xf32>
    %121 = arith.addf %115, %120 : vector<16x16xf32>
    %122 = arith.index_cast %arg0 : i32 to index
    %c22 = arith.constant 22 : index
    %123 = memref.load %arg1[%122, %c22] : memref<2x25xf32, #tpu.memory_space<smem>>
    %124 = vector.extract_strided_slice %20 {offsets = [16, 0], sizes = [16, 16], strides = [1, 1]} : vector<48x16xf32> to vector<16x16xf32>
    %125 = vector.broadcast %123 : f32 to vector<16x16xf32>
    %126 = arith.mulf %125, %124 : vector<16x16xf32>
    %127 = arith.addf %121, %126 : vector<16x16xf32>
    %128 = arith.index_cast %arg0 : i32 to index
    %c20 = arith.constant 20 : index
    %129 = memref.load %arg1[%128, %c20] : memref<2x25xf32, #tpu.memory_space<smem>>
    %130 = vector.extract_strided_slice %3 {offsets = [32, 0], sizes = [16, 16], strides = [1, 1]} : vector<48x16xf32> to vector<16x16xf32>
    %131 = vector.broadcast %129 : f32 to vector<16x16xf32>
    %132 = arith.mulf %131, %130 : vector<16x16xf32>
    %133 = arith.addf %127, %132 : vector<16x16xf32>
    %134 = arith.index_cast %arg0 : i32 to index
    %c23 = arith.constant 23 : index
    %135 = memref.load %arg1[%134, %c23] : memref<2x25xf32, #tpu.memory_space<smem>>
    %136 = vector.extract_strided_slice %20 {offsets = [32, 0], sizes = [16, 16], strides = [1, 1]} : vector<48x16xf32> to vector<16x16xf32>
    %137 = vector.broadcast %135 : f32 to vector<16x16xf32>
    %138 = arith.mulf %137, %136 : vector<16x16xf32>
    %139 = arith.addf %133, %138 : vector<16x16xf32>
    %c32 = arith.constant 32 : index
    %c0_16 = arith.constant 0 : index
    %140 = vector.load %arg9[%c32, %c0_16] : memref<48x16xf32, #tpu.memory_space<vmem>>, vector<16x16xf32>
    tpu.vector_store %arg9[%c32, %c0_16], %139 {strides = array<i32>} : memref<48x16xf32, #tpu.memory_space<vmem>>, vector<16x16xf32>,
    %c0_17 = arith.constant 0 : index
    %c0_18 = arith.constant 0 : index
    %141 = vector.load %arg9[%c0_17, %c0_18] : memref<48x16xf32, #tpu.memory_space<vmem>>, vector<48x16xf32>
    %142 = arith.subf %5, %141 : vector<48x16xf32>
    %143 = math.absf %142 : vector<48x16xf32>
    %cst = arith.constant dense<0.000000e+00> : vector<48xf32>
    %144 = vector.multi_reduction <add>, %143, %cst [1] : vector<48x16xf32> to vector<48xf32>
    %145 = vector.shape_cast %144 : vector<48xf32> to vector<48x1xf32>
    %cst_19 = arith.constant dense<0.000000e+00> : vector<1xf32>
    %146 = vector.multi_reduction <add>, %145, %cst_19 [0] : vector<48x1xf32> to vector<1xf32>
    %147 = vector.shape_cast %146 : vector<1xf32> to vector<1x1xf32>
    %148 = vector.broadcast %13 : f32 to vector<48x16xf32>
    %149 = arith.mulf %148, %20 : vector<48x16xf32>
    %150 = vector.broadcast %15 : f32 to vector<48x16xf32>
    %151 = arith.mulf %150, %141 : vector<48x16xf32>
    %152 = arith.subf %149, %151 : vector<48x16xf32>
    %c0_20 = arith.constant 0 : index
    %c0_21 = arith.constant 0 : index
    %153 = vector.load %arg7[%c0_20, %c0_21] : memref<16x4xf32, #tpu.memory_space<vmem>>, vector<16x4xf32>
    %cst_22 = arith.constant dense<0.000000e+00> : vector<48x4xf32>
    %154 = tpu.matmul %152, %153, %cst_22 {dimension_numbers = #tpu.dot_dimension_numbers<[1], [0], [0], [1], [0, 0, 1, 1], [], []>} : vector<48x16xf32>, vector<16x4xf32>, vector<48x4xf32> -> vector<48x4xf32>
    %c0_23 = arith.constant 0 : index
    %c0_24 = arith.constant 0 : index
    %155 = vector.load %arg6[%c0_23, %c0_24] : memref<12x48xf32, #tpu.memory_space<vmem>>, vector<12x48xf32>
    %cst_25 = arith.constant dense<0.000000e+00> : vector<12x4xf32>
    %156 = tpu.matmul %155, %154, %cst_25 {dimension_numbers = #tpu.dot_dimension_numbers<[1], [0], [0], [1], [0, 0, 1, 1], [], []>} : vector<12x48xf32>, vector<48x4xf32>, vector<12x4xf32> -> vector<12x4xf32>
    %157 = arith.subf %7, %156 : vector<12x4xf32>
    %158 = math.absf %157 : vector<12x4xf32>
    %cst_26 = arith.constant dense<0.000000e+00> : vector<12xf32>
    %159 = vector.multi_reduction <add>, %158, %cst_26 [1] : vector<12x4xf32> to vector<12xf32>
    %160 = vector.shape_cast %159 : vector<12xf32> to vector<12x1xf32>
    %cst_27 = arith.constant dense<0.000000e+00> : vector<1xf32>
    %161 = vector.multi_reduction <add>, %160, %cst_27 [0] : vector<12x1xf32> to vector<1xf32>
    %162 = vector.shape_cast %161 : vector<1xf32> to vector<1x1xf32>
    %cst_28 = arith.constant 6.000000e-01 : f32
    %163 = vector.broadcast %cst_28 : f32 to vector<1x1xf32>
    %164 = arith.mulf %163, %147 : vector<1x1xf32>
    %cst_29 = arith.constant 4.000000e-01 : f32
    %165 = vector.broadcast %cst_29 : f32 to vector<1x1xf32>
    %166 = arith.mulf %165, %162 : vector<1x1xf32>
    %167 = arith.addf %164, %166 : vector<1x1xf32>
    %c0_30 = arith.constant 0 : index
    %c0_31 = arith.constant 0 : index
    %c0_32 = arith.constant 0 : index
    %168 = vector.load %arg8[%c0_30, %c0_31, %c0_32] : memref<1x1x1xf32, #tpu.memory_space<vmem>>, vector<1x1x1xf32>
    %169 = vector.shape_cast %168 : vector<1x1x1xf32> to vector<1x1xf32>
    %170 = vector.shape_cast %167 : vector<1x1xf32> to vector<1x1x1xf32>
    tpu.vector_store %arg8[%c0_30, %c0_31, %c0_32], %170 {strides = array<i32>} : memref<1x1x1xf32, #tpu.memory_space<vmem>>, vector<1x1x1xf32>,
    return
  }
  func.func @transform_0(%arg0: i32, %arg1: memref<2x25xf32, #tpu.memory_space<smem>>) -> (i32, i32, i32) {
    %c0_i32 = arith.constant 0 : i32
    %c0_i32_0 = arith.constant 0 : i32
    %c0_i32_1 = arith.constant 0 : i32
    return %arg0, %c0_i32, %c0_i32_0 : i32, i32, i32
  }
  func.func @transform_1(%arg0: i32, %arg1: memref<2x25xf32, #tpu.memory_space<smem>>) -> (i32, i32, i32) {
    %c0_i32 = arith.constant 0 : i32
    %c0_i32_0 = arith.constant 0 : i32
    %c0_i32_1 = arith.constant 0 : i32
    return %arg0, %c0_i32, %c0_i32_0 : i32, i32, i32
  }
  func.func @transform_2(%arg0: i32, %arg1: memref<2x25xf32, #tpu.memory_space<smem>>) -> (i32, i32, i32) {
    %c0_i32 = arith.constant 0 : i32
    %c0_i32_0 = arith.constant 0 : i32
    %c0_i32_1 = arith.constant 0 : i32
    return %arg0, %c0_i32, %c0_i32_0 : i32, i32, i32
  }
  func.func @transform_3(%arg0: i32, %arg1: memref<2x25xf32, #tpu.memory_space<smem>>) -> (i32, i32, i32) {
    %c0_i32 = arith.constant 0 : i32
    %c0_i32_0 = arith.constant 0 : i32
    %c0_i32_1 = arith.constant 0 : i32
    return %arg0, %c0_i32, %c0_i32_0 : i32, i32, i32
  }
  func.func @transform_4(%arg0: i32, %arg1: memref<2x25xf32, #tpu.memory_space<smem>>) -> (i32, i32) {
    %c0_i32 = arith.constant 0 : i32
    %c0_i32_0 = arith.constant 0 : i32
    %c0_i32_1 = arith.constant 0 : i32
    return %c0_i32, %c0_i32_0 : i32, i32
  }
  func.func @transform_5(%arg0: i32, %arg1: memref<2x25xf32, #tpu.memory_space<smem>>) -> (i32, i32) {
    %c0_i32 = arith.constant 0 : i32
    %c0_i32_0 = arith.constant 0 : i32
    %c0_i32_1 = arith.constant 0 : i32
    return %c0_i32, %c0_i32_0 : i32, i32
  }
  func.func @transform_6(%arg0: i32, %arg1: memref<2x25xf32, #tpu.memory_space<smem>>) -> (i32, i32, i32) {
    %c0_i32 = arith.constant 0 : i32
    %c0_i32_0 = arith.constant 0 : i32
    %c0_i32_1 = arith.constant 0 : i32
    return %arg0, %c0_i32, %c0_i32_0 : i32, i32, i32
  }
}

</mosaic_0001>

<bundles_post_ra>
// kernel: tpu_custom_call.1
= control target key start
LH: loop header
LB: loop body
LE: loop exit
PB: predicated region body
PF: predicated region fallthrough
CT: control target
= control target key end

     0   :  { %s1336_s0 = inlined_call_operand.vmem [shape: f32[2,25], index: 0, kind: input, shape index: {}]   ;;  %s1337_s1 = inlined_call_operand.vmem [shape: f32[2,48,16], index: 1, kind: input, shape index: {}]   ;;  %s1338_s2 = inlined_call_operand.vmem [shape: f32[2,48,16], index: 2, kind: input, shape index: {}]   ;;  %s1339_s3 = inlined_call_operand.vmem [shape: f32[2,48,16], index: 3, kind: input, shape index: {}]   ;;  %s1340_s4 = inlined_call_operand.vmem [shape: f32[2,12,4], index: 4, kind: input, shape index: {}]   ;;  %s1341_s5 = inlined_call_operand.vmem [shape: f32[12,48], index: 5, kind: input, shape index: {}]   ;;  %s1342_s6 = inlined_call_operand.vmem [shape: f32[16,4], index: 6, kind: input, shape index: {}]   ;;  %s1343_s7 = inlined_call_operand.vmem [shape: f32[2,1,1], index: 7, kind: output, shape index: {}]  }
   0x1   :  { %s12_s26 = sshll.u32 %s1336_s0, 4  ;;  %s13_s26 = int_to_ptr.vmem [resolvable:$true] %s12_s26 }
   0x2   :  { %s972_s27 = scalar_lea.vmem %s13_s26, 32  ;;  %p977_p1 = scmp.lt.s32.totalorder %s13_s26, %s13_s26 }
   0x3   :  { %p973_p0 = scmp.ne.s32.totalorder %s13_s26, %s972_s27  ;;  %p978_p2 = scmp.lt.s32.totalorder %s972_s27, %s972_s27 }
   0x5   :  { %p979_p3 = por %p978_p2, %p977_p1 }
   0x7   :  { %p980_p4 = pnand %p979_p3, %p973_p0 }
   0x9   :  { %983 = shalt.err (!%p980_p4)  }
   0xa   :  { %s994_s28 = smov [#allocation4]  }
   0xb   :  { %15 = dma.vmem_to_smem %s13_s26, 32, %s994_s28, [#allocation3] }
   0xc   :  { %988 = dma.done.wait [#allocation3], 32 }
   0xd   :  { %989 = vsyncadd [#allocation3], 4294967264 }
   0xe   :  { %17 = sfence }
   0xf   :  { %s1038_s29 = smov 0  }
  0x10 LB: > { %s880_s0 = sadd.s32 4294967295, %s992_s29   ;;  %p884_p5 = scmp.ge.s32.totalorder %s992_s29, 1  ;;  %s992_s29 = sphi %s1038_s29, %s23_s29  }
  0x11   : > { %p249_p6 = scmp.lt.s32.totalorder %s992_s29, 3 }
  0x13   : > { %p250_p7 = pnand %p884_p5, %p249_p6 }
  0x14   : > { %v572_v0 = vld [vmem:[%s1342_s6] sm:$0xff] (!%p250_p7)  ;;  %v573_v1 = vld [vmem:[%s1342_s6 + $0x8] sm:$0xff] (!%p250_p7)  ;;  %p292_p8 = scmp.lt.s32.totalorder (!%p250_p7), %s880_s0, 1  ;;  %s1052_s11 = sshll.u32 (!%p250_p7), %s880_s0, 7  ;;  %vm408_vm0 = vcmask (!%p250_p7), 130048   ;;  %vm689_vm1 = vcmask (!%p250_p7), 392192  }
  0x15   : > { %253 = sbr.rel (%p250_p7) target bundleno = 684 (0x2ac), region = 44  ;;  %v946_v2 = vpack.c.bf16 (!%p250_p7), %v573_v1, %v572_v0  ;;  %s336_s12 = sld [smem:[#allocation4 + %s1052_s11]] (!%p250_p7)  ;;  %vm779_vm2 = vcmask (!%p250_p7), 27648   ;;  %vm775_vm3 = vcmask (!%p250_p7), 31744   ;;  %vm783_vm4 = vcmask (!%p250_p7), 1043456  }
  0x16   : > { %s337_s13 = sadd.s32 (!%p250_p7), 1, %s1052_s11  ;;  %s339_s15 = sadd.s32 (!%p250_p7), 2, %s1052_s11  ;;  %vm795_vm5 = vcmask (!%p250_p7), 0  }
  0x17   : > { %947 = vmatprep.subr.bf16.mxu0 (!%p250_p7), %v946_v2  ;;  %s338_s14 = sld [smem:[#allocation4 + %s337_s13]] (!%p250_p7)  ;;  %s341_s18 = sadd.s32 (!%p250_p7), 3, %s1052_s11 }
  0x18   : > { %949 = vmatpush3.bf16.msra.mxu0 (!%p250_p7), %v946_v2  ;;  %s1060_s17 = sld [smem:[#allocation4 + %s339_s15]] (!%p250_p7)  ;;  %s363_s19 = sadd.s32 (!%p250_p7), 4, %s1052_s11 }
  0x19   : > { %s1080_s30 = sld [smem:[#allocation4 + %s341_s18]] (!%p250_p7)  ;;  %s368_s9 = sadd.s32 (!%p250_p7), 7, %s1052_s11 }
  0x1a   : > { %s1082_s8 = sld [smem:[#allocation4 + %s363_s19]] (!%p250_p7)  ;;  %s375_s13 = sadd.s32 (!%p250_p7), 10, %s1052_s11 }
  0x1b   : > { %v343_v4 = vstv (!%p250_p7), %s336_s12  ;;  %s1086_s10 = sld [smem:[#allocation4 + %s368_s9]] (!%p250_p7)  ;;  %s394_s19 = sadd.s32 (!%p250_p7), 6, %s1052_s11 }
  0x1c   : > { %s1345_s0 = smov (!%p292_p8, %s880_s0), 1  ;;  %s1092_s15 = sld [smem:[#allocation4 + %s375_s13]] }
  0x1d   : > { %s962_s16 = smul.u32 48, %s1345_s0  ;;  %v350_v7 = vstv %s338_s14  ;;  %s387_s14 = sadd.s32 8, %s1052_s11 }
  0x1e   : > { %s1107_s18 = sld [smem:[#allocation4 + %s387_s14]]  ;;  %s401_s21 = sadd.s32 9, %s1052_s11  ;;  %v1185_v49 = vstv %s1060_s17 }
  0x1f   : > { %s1067_s22 = scalar_lea.vmem %s1337_s1, %s962_s16  ;;  %s1072_s25 = scalar_lea.vmem %s1338_s2, %s962_s16  ;;  %v1211_v61 = vstv %s1080_s30 }
  0x20   : > { %s1077_s28 = scalar_lea.vmem %s1339_s3, %s962_s16  ;;  %v315_v3 = vld [vmem:[%s1067_s22] sm:$0xff]  ;;  %v317_v5 = vld [vmem:[%s1067_s22 + $0x10] sm:$0xff]  ;;  %s380_s16 = sadd.s32 5, %s1052_s11  ;;  %v316_v15 = vld [vmem:[%s1067_s22 + $0x8] sm:$0xff]  ;;  %v365_v20 = vstv %s1082_s8 }
  0x21   : > { %v344_v6 = vmul.f32 %v343_v4, %v315_v3  ;;  %v1090_v8 = vld [vmem:[%s1077_s28] sm:$0xff]  ;;  %v1096_v9 = vld [vmem:[%s1077_s28 + $0x10] sm:$0xff]  ;;  %s1099_s12 = sld [smem:[#allocation4 + %s380_s16]]  ;;  %v346_v13 = vmul.f32 %v343_v4, %v317_v5  ;;  %v1120_v18 = vld [vmem:[%s1077_s28 + $0x8] sm:$0xff]  ;;  %s411_s24 = sadd.s32 11, %s1052_s11  ;;  %v370_v25 = vstv %s1086_s10  ;;  %v345_v26 = vmul.f32 %v343_v4, %v316_v15 }
  0x22   : > { %v351_v10 = vmul.f32 %v350_v7, %v1090_v8  ;;  %v319_v11 = vld [vmem:[%s1067_s22 + $0x20] sm:$0xff]  ;;  %v353_v14 = vmul.f32 %v350_v7, %v1096_v9  ;;  %s1116_s20 = sld [smem:[#allocation4 + %s394_s19]]  ;;  %v318_v19 = vld [vmem:[%s1067_s22 + $0x18] sm:$0xff]  ;;  %v320_v21 = vld [vmem:[%s1067_s22 + $0x28] sm:$0xff]  ;;  %s416_s27 = sadd.s32 14, %s1052_s11  ;;  %v352_v32 = vmul.f32 %v350_v7, %v1120_v18  ;;  %v377_v34 = vstv %s1092_s15 }
  0x23   : > { %v1104_v12 = vld [vmem:[%s1072_s25] sm:$0xff]  ;;  %s1124_s23 = sld [smem:[#allocation4 + %s401_s21]]  ;;  %v1129_v22 = vld [vmem:[%s1072_s25 + $0x10] sm:$0xff]  ;;  %v348_v23 = vmul.f32 %v343_v4, %v319_v11  ;;  %v1137_v27 = vld [vmem:[%s1077_s28 + $0x18] sm:$0xff]  ;;  %s423_s8 = sadd.s32 17, %s1052_s11  ;;  %v347_v33 = vmul.f32 %v343_v4, %v318_v19  ;;  %v349_v38 = vmul.f32 %v343_v4, %v320_v21 }
  0x24   : > { %v1112_v16 = vld [vmem:[%s1077_s28 + $0x20] sm:$0xff]  ;;  %v1114_v17 = vadd.f32 %v351_v10, %v344_v6  ;;  %v366_v24 = vmul.f32 %v365_v20, %v1104_v12  ;;  %s1133_s26 = sld [smem:[#allocation4 + %s411_s24]]  ;;  %v1140_v28 = vld [vmem:[%s1077_s28 + $0x28] sm:$0xff]  ;;  %v1143_v30 = vadd.f32 %v353_v14, %v346_v13  ;;  %s428_s9 = sadd.s32 12, %s1052_s11  ;;  %v389_v41 = vstv %s1107_s18  ;;  %v324_v2 = vld [vmem:[%s1072_s25 + $0x18] sm:$0xff] }
  0x25   : > { %v355_v29 = vmul.f32 %v350_v7, %v1112_v16  ;;  %s1146_s22 = sld [smem:[#allocation4 + %s416_s27]]  ;;  %v1156_v36 = vld [vmem:[%s1072_s25 + $0x8] sm:$0xff]  ;;  %v1159_v37 = vld [vmem:[%s1072_s25 + $0x20] sm:$0xff]  ;;  %s435_s13 = sadd.s32 15, %s1052_s11  ;;  %v354_v42 = vmul.f32 %v350_v7, %v1137_v27  ;;  %v356_v43 = vmul.f32 %v350_v7, %v1140_v28  ;;  %v1174_v45 = vadd.f32 %v352_v32, %v345_v26 }
  0x26   : > { %v371_v31 = vmul.f32 %v370_v25, %v1114_v17  ;;  %s1152_s28 = sld [smem:[#allocation4 + %s423_s8]]  ;;  %s442_s14 = sadd.s32 13, %s1052_s11  ;;  %v390_v48 = vmul.f32 %v389_v41, %v1143_v30  ;;  %v367_v50 = vmul.f32 %v365_v20, %v1156_v36  ;;  %v1229_v6 = vmul.f32 %v1185_v49, %v1114_v17 }
  0x27   : > { %v382_v35 = vstv %s1099_s12  ;;  %s1165_s10 = sld [smem:[#allocation4 + %s428_s9]]  ;;  %v1176_v46 = vadd.f32 %v355_v29, %v348_v23  ;;  %s449_s19 = sadd.s32 16, %s1052_s11  ;;  %v372_v57 = vmul.f32 %v370_v25, %v1174_v45  ;;  %v1202_v58 = vadd.f32 %v354_v42, %v347_v33  ;;  %v326_v33 = vld [vmem:[%s1072_s25 + $0x28] sm:$0xff] }
  0x28   : > { %v373_v39 = vadd.f32 %v371_v31, %v366_v24  ;;  %v383_v40 = vmul.f32 %v382_v35, %v1129_v22  ;;  %v396_v44 = vstv %s1116_s20  ;;  %s1171_s16 = sld [smem:[#allocation4 + %s435_s13]]  ;;  %s458_s24 = sadd.s32 18, %s1052_s11  ;;  %v1204_v59 = vadd.f32 %v356_v43, %v349_v38 }
  0x29   : > { %s1181_s18 = sld [smem:[#allocation4 + %s442_s14]]  ;;  %v397_v51 = vmul.f32 %v396_v44, %v1159_v37  ;;  %v403_v52 = vstv %s1124_s23  ;;  %s463_s27 = sadd.s32 21, %s1052_s11  ;;  %v374_v13 = vadd.f32 %v372_v57, %v367_v50  ;;  %v384_v21 = vmul.f32 %v382_v35, %v324_v2 }
  0x2a   : > { %v378_v47 = vadd.f32 %v377_v34, %v373_v39  ;;  %v413_v53 = vstv %s1133_s26  ;;  %s1193_s21 = sld [smem:[#allocation4 + %s449_s19]]  ;;  %s470_s8 = sadd.s32 24, %s1052_s11  ;;  %v404_v63 = vmul.f32 %v403_v52, %v1176_v46  ;;  %v391_v23 = vmul.f32 %v389_v41, %v1202_v58 }
  0x2b   : > { %v414_v55 = vmul.f32 %v413_v53, %v1104_v12  ;;  %v418_v56 = vstv %s1146_s22  ;;  %s1198_s17 = sld [smem:[#allocation4 + %s458_s24]]  ;;  %s475_s9 = sadd.s32 19, %s1052_s11  ;;  %v415_v10 = vmul.f32 %v413_v53, %v1156_v36  ;;  %v379_v43 = vadd.f32 %v377_v34, %v374_v13 }
  0x2c   : > { %v385_v54 = vadd.f32 %v383_v40, %v378_v47  ;;  %v419_v60 = vmul.f32 %v418_v56, %v1114_v17  ;;  %s1207_s26 = sld [smem:[#allocation4 + %s463_s27]]  ;;  %v425_v0 = vstv %s1152_s28  ;;  %s482_s13 = sadd.s32 22, %s1052_s11  ;;  %v420_v20 = vmul.f32 %v418_v56, %v1174_v45 }
  0x2d   : > { %v430_v1 = vstv %s1165_s10  ;;  %s1218_s22 = sld [smem:[#allocation4 + %s470_s8]]  ;;  %s489_s10 = sadd.s32 20, %s1052_s11  ;;  %v398_v53 = vmul.f32 %v396_v44, %v326_v33 }
  0x2e   : > { %v392_v62 = vadd.f32 %v390_v48, %v385_v54  ;;  %v421_v3 = vadd.f32 %v419_v60, %v414_v55  ;;  %v431_v4 = vmul.f32 %v430_v1, %v1129_v22  ;;  %v437_v5 = vstv %s1171_s16  ;;  %s1224_s30 = sld [smem:[#allocation4 + %s475_s9]]  ;;  %s496_s14 = sadd.s32 23, %s1052_s11 }
  0x2f   : > { %v444_v11 = vstv %s1181_s18  ;;  %s1233_s28 = sld [smem:[#allocation4 + %s482_s13]]  ;;  %v438_v15 = vmul.f32 %v437_v5, %v1143_v30  ;;  %v432_v55 = vmul.f32 %v430_v1, %v324_v2  ;;  %v439_v34 = vmul.f32 %v437_v5, %v1202_v58  ;;  %s901_s20 = sshll.u32 %s1345_s0, 4 }
  0x30   : > { %v399_v7 = vadd.f32 %v397_v51, %v392_v62  ;;  %v426_v14 = vadd.f32 %v425_v0, %v421_v3  ;;  %v451_v19 = vstv %s1193_s21  ;;  %s1238_s16 = sld [smem:[#allocation4 + %s489_s10]]  ;;  %v445_v29 = vmul.f32 %v444_v11, %v1159_v37  ;;  %s311_s21 = scalar_lea.vmem %s1340_s4, %s901_s20 }
  0x31   : > { %v460_v25 = vstv %s1198_s17  ;;  %s1246_s18 = sld [smem:[#allocation4 + %s496_s14]]  ;;  %v452_v35 = vmul.f32 %v451_v19, %v1176_v46  ;;  %s314_s27 = scalar_lea.vmem %s1343_s7, %s1345_s0 }
  0x32   : > { %v406_v24 = vadd.f32 %v404_v63, %v399_v7  ;;  %v433_v26 = vadd.f32 %v431_v4, %v426_v14  ;;  %v461_v31 = vmul.f32 %v460_v25, %v1104_v12  ;;  %v465_v32 = vstv %s1207_s26 }
  0x33   : > { %v462_v38 = vmul.f32 %v460_v25, %v1156_v36  ;;  %v466_v39 = vmul.f32 %v465_v32, %v1114_v17  ;;  %v472_v40 = vstv %s1218_s22  ;;  %v422_v12 = vadd.f32 %v420_v20, %v415_v10 }
  0x34   : > { %409 = vst.msk [vmem:[#allocation2] sm:$0xff] %vm408_vm0, %v406_v24  ;;  %v440_v41 = vadd.f32 %v438_v15, %v433_v26  ;;  %v477_v42 = vstv %s1224_s30  ;;  %v467_v51 = vmul.f32 %v465_v32, %v1174_v45  ;;  %v405_v36 = vmul.f32 %v403_v52, %v1204_v59 }
  0x35   : > { %v468_v47 = vadd.f32 %v466_v39, %v461_v31  ;;  %v478_v48 = vmul.f32 %v477_v42, %v1129_v22  ;;  %v484_v50 = vstv %s1233_s28  ;;  %v479_v63 = vmul.f32 %v477_v42, %v324_v2 }
  0x36   : > { %v447_v54 = vadd.f32 %v445_v29, %v440_v41  ;;  %v491_v17 = vstv %s1238_s16  ;;  %v485_v57 = vmul.f32 %v484_v50, %v1143_v30  ;;  %v386_v22 = vadd.f32 %v384_v21, %v379_v43 }
  0x37   : > { %v473_v56 = vadd.f32 %v472_v40, %v468_v47  ;;  %v498_v60 = vstv %s1246_s18  ;;  %v492_v4 = vmul.f32 %v491_v17, %v1159_v37  ;;  %v427_v7 = vadd.f32 %v425_v0, %v422_v12 }
  0x38   : > { %v454_v62 = vadd.f32 %v452_v35, %v447_v54  ;;  %v469_v44 = vadd.f32 %v467_v51, %v462_v38  ;;  %v446_v10 = vmul.f32 %v444_v11, %v326_v33  ;;  %v486_v52 = vmul.f32 %v484_v50, %v1202_v58 }
  0x39   : > { %v480_v3 = vadd.f32 %v478_v48, %v473_v56  ;;  %v499_v1 = vmul.f32 %v498_v60, %v1176_v46  ;;  %v393_v14 = vadd.f32 %v391_v23, %v386_v22  ;;  %v434_v20 = vadd.f32 %v432_v55, %v427_v7  ;;  %v687_v56 = vld [vmem:[%s1341_s5] sm:$0xff] }
  0x3a   : > { %456 = vst.msk [vmem:[#allocation2 + $0x10] sm:$0xff] %vm408_vm0, %v454_v62  ;;  %v474_v2 = vadd.f32 %v472_v40, %v469_v44  ;;  %v453_v21 = vmul.f32 %v451_v19, %v1204_v59  ;;  %v493_v24 = vmul.f32 %v491_v17, %v326_v33  ;;  %v500_v31 = vmul.f32 %v498_v60, %v1204_v59 }
  0x3b   : > { %v505_v13 = vld [vmem:[#allocation2] sm:$0xff]  ;;  %v487_v15 = vadd.f32 %v485_v57, %v480_v3  ;;  %v400_v37 = vadd.f32 %v398_v53, %v393_v14  ;;  %v441_v25 = vadd.f32 %v439_v34, %v434_v20  ;;  %v555_v39 = vmul.f32 %v1185_v49, %v1143_v30  ;;  %943 = vmatprep.mubr.msk.f32.mxu1 %vm689_vm1, %v687_v56 }
  0x3c   : > { %v560_v5 = vmul.f32 %v1211_v61, %v505_v13  ;;  %v481_v26 = vadd.f32 %v479_v63, %v474_v2  ;;  %v554_v41 = vmul.f32 %v1185_v49, %v1174_v45  ;;  %v556_v48 = vmul.f32 %v1185_v49, %v1202_v58  ;;  %v688_v2 = vld [vmem:[%s1341_s5 + $0x8] sm:$0xf] }
  0x3d   : > { %v494_v0 = vadd.f32 %v492_v4, %v487_v15  ;;  %v407_v29 = vadd.f32 %v405_v36, %v400_v37  ;;  %v448_v23 = vadd.f32 %v446_v10, %v441_v25  ;;  %v557_v50 = vmul.f32 %v1185_v49, %v1176_v46 }
  0x3e   : > { %v566_v11 = vsub.f32 %v1229_v6, %v560_v5  ;;  %v488_v35 = vadd.f32 %v486_v52, %v481_v26  ;;  %v558_v54 = vmul.f32 %v1185_v49, %v1204_v59  ;;  %v511_v49 = vsub.f32 %v1090_v8, %v505_v13 }
  0x3f   : > { %v501_v32 = vadd.f32 %v499_v1, %v494_v0  ;;  %410 = vst.msk [vmem:[#allocation2 + $0x8] sm:$0xff] %vm408_vm0, %v407_v29  ;;  %v455_v19 = vadd.f32 %v453_v21, %v448_v23  ;;  %v334_v21 = vld [vmem:[%s311_s21 + $0x8] sm:$0xf] }
  0x40   : > { %922 = vmatprep.mubr.msk.f32.mxu0 %vm408_vm0, %v566_v11  ;;  %v495_v33 = vadd.f32 %v493_v24, %v488_v35  ;;  %v517_v60 = vand.u32 2147483647, %v511_v49  ;;  %v333_v24 = vld [vmem:[%s311_s21] sm:$0xff] }
  0x41   : > { %503 = vst.msk [vmem:[#allocation2 + $0x20] sm:$0xff] %vm408_vm0, %v501_v32  ;;  %v507_v38 = vld [vmem:[#allocation2 + $0x10] sm:$0xff]  ;;  %457 = vst.msk [vmem:[#allocation2 + $0x18] sm:$0xff] %vm408_vm0, %v455_v19 }
  0x42   : > { %v502_v6 = vadd.f32 %v500_v31, %v495_v33  ;;  %v562_v40 = vmul.f32 %v1211_v61, %v507_v38  ;;  %v513_v59 = vsub.f32 %v1096_v9, %v507_v38  ;;  %v523_v3 = vsel %vm408_vm0, %v517_v60, 0.0 }
  0x43   : > { %524 = vadd.xlane.f32.xlu0 %v523_v3 }
  0x44   : > { %504 = vst.msk [vmem:[#allocation2 + $0x28] sm:$0xff] %vm408_vm0, %v502_v6  ;;  %v568_v47 = vsub.f32 %v555_v39, %v562_v40  ;;  %v519_v34 = vand.u32 2147483647, %v513_v59 }
  0x46   : > { %v506_v42 = vld [vmem:[#allocation2 + $0x8] sm:$0xff]  ;;  %v529_v4 = vsel %vm408_vm0, %v519_v34, 0.0 }
  0x47   : > { %v561_v43 = vmul.f32 %v1211_v61, %v506_v42  ;;  %530 = vadd.xlane.f32.xlu1 %v529_v4 }
  0x48   : > { %v509_v12 = vld [vmem:[#allocation2 + $0x20] sm:$0xff]  ;;  %v508_v30 = vld [vmem:[#allocation2 + $0x18] sm:$0xff] }
  0x49   : > { %v564_v51 = vmul.f32 %v1211_v61, %v509_v12  ;;  %v567_v53 = vsub.f32 %v554_v41, %v561_v43  ;;  %v563_v36 = vmul.f32 %v1211_v61, %v508_v30  ;;  %v514_v57 = vsub.f32 %v1137_v27, %v508_v30 }
  0x4a   : > { %v515_v63 = vsub.f32 %v1112_v16, %v509_v12 }
  0x4b   : > { %923 = vmatmul.mubr.msk.f32.vlgmr.msra.gmra.mrb[0].mxu0 %vm408_vm0, %v567_v53  ;;  %v510_v45 = vld [vmem:[#allocation2 + $0x28] sm:$0xff]  ;;  %v569_v17 = vsub.f32 %v556_v48, %v563_v36  ;;  %v570_v55 = vsub.f32 %v557_v50, %v564_v51  ;;  %v520_v22 = vand.u32 2147483647, %v514_v57 }
  0x4c   : > { %925 = vmatprep.mubr.msk.f32.mxu0 %vm408_vm0, %v568_v47  ;;  %v565_v58 = vmul.f32 %v1211_v61, %v510_v45  ;;  %v512_v61 = vsub.f32 %v1120_v18, %v506_v42  ;;  %v521_v7 = vand.u32 2147483647, %v515_v63  ;;  %v516_v18 = vsub.f32 %v1140_v28, %v510_v45 }
  0x4d   : > { %v532_v9 = vsel %vm408_vm0, %v520_v22, 0.0 }
  0x4e   : > { %v571_v46 = vsub.f32 %v558_v54, %v565_v58  ;;  %v518_v62 = vand.u32 2147483647, %v512_v61  ;;  %533 = vadd.xlane.f32.xlu1 %v532_v9  ;;  %v535_v27 = vsel %vm408_vm0, %v521_v7, 0.0  ;;  %v522_v44 = vand.u32 2147483647, %v516_v18 }
  0x4f   : > { %926 = vmatmul.mubr.msk.f32.gmra.mrb[2].mxu0 %vm408_vm0, %v569_v17 }
  0x50   : > { %928 = vmatprep.mubr.msk.f32.mxu0 %vm408_vm0, %v570_v55  ;;  %v526_v8 = vsel %vm408_vm0, %v518_v62, 0.0  ;;  %v538_v16 = vsel %vm408_vm0, %v522_v44, 0.0 }
  0x51   : > { %527 = vadd.xlane.f32.xlu0 %v526_v8 }
  0x53   : > { %929 = vmatmul.mubr.msk.f32.gmra.mrb[4].mxu0 %vm408_vm0, %v571_v46 }
  0x55   : > { %536 = vadd.xlane.f32.xlu0 %v535_v27 }
  0x59   : > { %539 = vadd.xlane.f32.xlu0 %v538_v16 }
  0xd0   : > { %v525_v23 = vpop.xlane.xlu0 %524 }
  0xd4   : > { %v531_v19 = vpop.xlane.xlu1 %530 }
  0xdb   : > { %v534_v6 = vpop.xlane.xlu1 %533 }
  0xde   : > { %v528_v35 = vpop.xlane.xlu0 %527 }
  0xdf   : > { %v541_v33 = vadd.f32 %v528_v35, %v525_v23 }
  0xe1   : > { %v542_v38 = vadd.f32 %v541_v33, %v531_v19 }
  0xe2   : > { %v537_v39 = vpop.xlane.xlu0 %536 }
  0xe3   : > { %v543_v40 = vadd.f32 %v542_v38, %v534_v6 }
  0xe5   : > { %v544_v41 = vadd.f32 %v543_v40, %v537_v39 }
  0xe6   : > { %v540_v42 = vpop.xlane.xlu0 %539 }
  0xe7   : > { %v545_v43 = vadd.f32 %v544_v41, %v540_v42 }
  0xe9   : > { %v546_v12 = vrot.slane %v545_v43, 4 }
  0xeb   : > { %v547_v47 = vadd.f32 %v546_v12, %v545_v43 }
  0xed   : > { %v548_v50 = vrot.slane %v547_v47, 2 }
  0xef   : > { %v549_v36 = vadd.f32 %v548_v50, %v547_v47 }
  0xf1   : > { %v550_v17 = vrot.slane %v549_v36, 1 }
  0xf3   : > { %v551_v46 = vadd.f32 %v550_v17, %v549_v36 }
  0xf5   : > { %v792_v59 = vmul.f32 0.6, %v551_v46 }
 0x11e   : > { %v924_v10 = vpop.f32.mrb[0].mxu0 }
 0x11f   : > { %v658_v52 = vpop.f32.mrb[1].mxu0 }
 0x120   : > { %v950_v1 = vpack.c.bf16 %v924_v10, %v658_v52 }
 0x122   : > { %v927_v13 = vpop.f32.mrb[2].mxu0  ;;  %951 = vmatprep.subr.bf16.mxu1 %v950_v1 }
 0x123   : > { %v668_v14 = vpop.f32.mrb[3].mxu0  ;;  %953 = vmatpush3.bf16.msra.mxu1 %v950_v1 }
 0x124   : > { %v954_v15 = vpack.c.bf16 %v927_v13, %v668_v14 }
 0x126   : > { %v930_v5 = vpop.f32.mrb[4].mxu0  ;;  %955 = vmatprep.subr.bf16.mxu1 %v954_v15 }
 0x127   : > { %v678_v28 = vpop.f32.mrb[5].mxu0  ;;  %957 = vmatpush3.bf16.msra.mxu1 %v954_v15 }
 0x128   : > { %v958_v20 = vpack.c.bf16 %v930_v5, %v678_v28 }
 0x12a   : > { %959 = vmatprep.subr.bf16.mxu1 %v958_v20 }
 0x12b   : > { %961 = vmatpush3.bf16.msra.mxu1 %v958_v20 }
 0x12e   : > { %944 = vmatmul.mubr.msk.f32.vlgmr.msra.gmra.mrb[0].mxu1 %vm689_vm1, %v688_v2 }
 0x201   : > { %v945_v37 = vpop.f32.mrb[0].mxu1 }
 0x202   : > { %v772_v0 = vsub.f32 %v334_v21, %v945_v37  ;;  %v762_v11 = vpop.f32.mrb[1].mxu1 }
 0x203   : > { %v771_v25 = vsub.f32 %v333_v24, %v762_v11 }
 0x204   : > { %v774_v26 = vand.u32 2147483647, %v772_v0 }
 0x205   : > { %v773_v29 = vand.u32 2147483647, %v771_v25 }
 0x206   : > { %v780_v31 = vsel %vm779_vm2, %v774_v26, 0.0 }
 0x207   : > { %781 = vadd.xlane.f32.xlu1 %v780_v31  ;;  %v776_v32 = vsel %vm775_vm3, %v773_v29, 0.0 }
 0x20b   : > { %777 = vadd.xlane.f32.xlu1 %v776_v32 }
 0x294   : > { %v782_v48 = vpop.xlane.xlu1 %781 }
 0x295   : > { %v784_v51 = vsel %vm783_vm4, %v782_v48, 0.0 }
 0x298   : > { %v778_v53 = vpop.xlane.xlu1 %777 }
 0x299   : > { %v785_v30 = vadd.f32 %v784_v51, %v778_v53 }
 0x29b   : > { %v786_v45 = vrot.slane %v785_v30, 4 }
 0x29d   : > { %v787_v54 = vadd.f32 %v786_v45, %v785_v30 }
 0x29f   : > { %v788_v55 = vrot.slane %v787_v54, 2 }
 0x2a1   : > { %v789_v58 = vadd.f32 %v788_v55, %v787_v54 }
 0x2a3   : > { %v790_v56 = vrot.slane %v789_v58, 1 }
 0x2a5   : > { %v791_v49 = vadd.f32 %v790_v56, %v789_v58 }
 0x2a7   : > { %v793_v61 = vmul.f32 0.4, %v791_v49 }
 0x2a9   : > { %v794_v57 = vadd.f32 %v793_v61, %v792_v59 }
 0x2ab   : > { %796 = vst.msk [vmem:[%s314_s27] sm:$0x1] %vm795_vm5, %v794_v57 }
 0x2ac PF: > { %s23_s29 = sadd.s32 1, %s992_s29  }
 0x2ad   : > { %p20_p9 = scmp.ge.s32.totalorder %s23_s29, 4  }
 0x2af   :  { %22 = sbr.rel (!%p20_p9) target bundleno = 16 (0x10), region = 83 }

</bundles_post_ra>
